<compile_context>
chip_gen: v7x
topology: tpu7x:2x2x1
jax: 0.10.0
libtpu: 0.0.40
codegen_flags: <defaults>
</compile_context>

<pallas_src>
import functools

import jax
import jax.numpy as jnp
from jax import lax
from jax.experimental import pallas as pl
from jax.experimental.pallas import tpu as pltpu


def _round_up(a, m):
    return ((a + m - 1) // m) * m


def _deepsets_kernel(*refs, tb, n, has_mask):
    if has_mask:
        (x_ref, m_ref,
         w1_ref, b1_ref, w2_ref, b2_ref, w3_ref, b3_ref, w4_ref, b4_ref,
         o_ref) = refs
    else:
        (x_ref,
         w1_ref, b1_ref, w2_ref, b2_ref, w3_ref, b3_ref, w4_ref, b4_ref,
         o_ref) = refs
        m_ref = None

    cdt = w1_ref.dtype  # compute dtype fed to the MXU (f32 or bf16)

    # ---- phi, first Linear + ReLU over the collapsed (TB*N, Dp) rows -------
    x = x_ref[...]                                                   # (TB*N, Dp)
    h = jnp.dot(x.astype(cdt), w1_ref[...],
                preferred_element_type=jnp.float32) + b1_ref[...]
    h = jnp.maximum(h, 0.0)                                          # (TB*N, Hp) f32

    # ---- masked pool over the set axis as a single MXU matmul --------------
    # Block-diagonal pooling matrix P (TB, TB*N):
    #   P[b, j] = mask[b, j - b*N]  if b*N <= j < (b+1)*N else 0
    row = lax.broadcasted_iota(jnp.int32, (tb, tb * n), 0)
    col = lax.broadcasted_iota(jnp.int32, (tb, tb * n), 1)
    lo = row * n
    sel = (col >= lo) & (col < lo + n)                               # bool (TB, TB*N)
    if has_mask:
        m = m_ref[...]                                               # (1, TB*N) f32
        pool = jnp.where(sel, m, 0.0)                                # (TB, TB*N)
        counts = jnp.sum(pool, axis=-1, keepdims=True)               # (TB, 1)
    else:
        pool = sel.astype(jnp.float32)
        counts = jnp.float32(n)

    pooled_pre = jnp.dot(pool.astype(cdt), h.astype(cdt),
                         preferred_element_type=jnp.float32)         # (TB, Hp)
    # w2 / b2 factored out of the sum (exact up to FP reassociation).
    pooled = jnp.dot(pooled_pre.astype(cdt), w2_ref[...],
                     preferred_element_type=jnp.float32) + counts * b2_ref[...]

    # ---- f: set-level MLP ---------------------------------------------------
    g = jnp.dot(pooled.astype(cdt), w3_ref[...],
                preferred_element_type=jnp.float32) + b3_ref[...]
    g = jnp.maximum(g, 0.0)
    out = jnp.dot(g.astype(cdt), w4_ref[...],
                  preferred_element_type=jnp.float32) + b4_ref[...]

    o_ref[...] = out.astype(o_ref.dtype)                             # (TB, Op) lane-dense


def deepsets_encoder(x, params, mask=None, *, compute_dtype=jnp.float32,
                     batch_tile=None):
    """x: (B, N, D_in) f32; mask: optional (B, N); returns (B, D_out) f32."""
    B, N, D_in = x.shape
    w1, b1, w2, b2, w3, b3, w4, b4 = params
    H = w1.shape[1]
    D_out = w4.shape[1]

    # Lane-dense padded feature sizes.
    Dp = _round_up(D_in, 128)
    Hp = _round_up(H, 128)
    Op = _round_up(D_out, 128)

    # Batch tile: target >= 256 MXU rows per step, keep sublane tiling legal.
    if batch_tile is None:
        tb = min(B, max(1, -(-256 // N)))
    else:
        tb = min(B, int(batch_tile))
    if tb < B and tb % 8 != 0:
        tb = min(B, _round_up(tb, 8))
    B_pad = _round_up(B, tb)
    grid = (B_pad // tb,)

    cdt = jnp.dtype(compute_dtype)

    # Pad + collapse x to (B_pad*N, Dp); cast once here for the MXU.
    xp = jnp.pad(x, ((0, B_pad - B), (0, 0), (0, Dp - D_in)))
    xp = xp.reshape(B_pad * N, Dp).astype(cdt)

    def pad_w(w, r, c):
        return jnp.pad(w, ((0, r - w.shape[0]), (0, c - w.shape[1]))).astype(cdt)

    def pad_b(b, c):
        b2d = b.reshape(1, -1)
        return jnp.pad(b2d, ((0, 0), (0, c - b2d.shape[1]))).astype(jnp.float32)

    w1p, w2p = pad_w(w1, Dp, Hp), pad_w(w2, Hp, Hp)
    w3p, w4p = pad_w(w3, Hp, Hp), pad_w(w4, Hp, Op)
    b1p, b2p, b3p, b4p = pad_b(b1, Hp), pad_b(b2, Hp), pad_b(b3, Hp), pad_b(b4, Op)

    # Weights/biases: full blocks with constant index maps -> VMEM resident.
    const = lambda a: pl.BlockSpec(a.shape, lambda i: (0, 0))
    x_spec = pl.BlockSpec((tb * N, Dp), lambda i: (i, 0))
    out_spec = pl.BlockSpec((tb, Op), lambda i: (i, 0))
    w_specs = [const(w1p), const(b1p), const(w2p), const(b2p),
               const(w3p), const(b3p), const(w4p), const(b4p)]

    has_mask = mask is not None
    if has_mask:
        # Lane-major mask, reshaped so each grid step gets its (1, TB*N) row.
        mp = jnp.pad(mask.astype(jnp.float32), ((0, B_pad - B), (0, 0)))
        mp = mp.reshape(B_pad // tb, tb * N)
        m_specs = [pl.BlockSpec((1, tb * N), lambda i: (i, 0))]
        args = (xp, mp, w1p, b1p, w2p, b2p, w3p, b3p, w4p, b4p)
    else:
        m_specs = []
        args = (xp, w1p, b1p, w2p, b2p, w3p, b3p, w4p, b4p)

    # Rough VMEM budget: double-buffered blocks + resident weights (works on
    # v5e 16 MiB default-scoped and stays well under v7x's 64 MiB physical).
    est = 2 * (tb * N * Dp * cdt.itemsize + tb * Op * 4
               + (8 * tb * N * 4 if has_mask else 0))
    est += 2 * (Dp * Hp + 2 * Hp * Hp + Hp * Op) * cdt.itemsize + 8 * 8 * 128 * 4
    vmem_limit = int(min(64 * 2**20, max(32 * 2**20, 4 * est)))

    kernel = functools.partial(_deepsets_kernel, tb=tb, n=N, has_mask=has_mask)

    out = pl.pallas_call(
        kernel,
        out_shape=jax.ShapeDtypeStruct((B_pad, Op), x.dtype),
        grid_spec=pltpu.PrefetchScalarGridSpec(
            num_scalar_prefetch=0,
            grid=grid,
            in_specs=[x_spec] + m_specs + w_specs,
            out_specs=out_spec,
        ),
        compiler_params=pltpu.CompilerParams(
            dimension_semantics=("parallel",),
            vmem_limit_bytes=vmem_limit),
    )(*args)
    return out[:B, :D_out]


def _reference(x, params, mask=None):
    w1, b1, w2, b2, w3, b3, w4, b4 = params
    h = jnp.maximum(x @ w1 + b1, 0.0)
    h = h @ w2 + b2
    if mask is None:
        pooled = h.sum(axis=-2)
    else:
        pooled = (mask[..., None] * h).sum(axis=-2)
    g = jnp.maximum(pooled @ w3 + b3, 0.0)
    return g @ w4 + b4


def _init_params(key, D_in, H, D_out):
    ks = jax.random.split(key, 4)
    s = 0.1
    w1 = s * jax.random.normal(ks[0], (D_in, H), jnp.float32)
    b1 = jnp.zeros((H,), jnp.float32)
    w2 = s * jax.random.normal(ks[1], (H, H), jnp.float32)
    b2 = jnp.full((H,), 0.01, jnp.float32)
    w3 = s * jax.random.normal(ks[2], (H, H), jnp.float32)
    b3 = jnp.full((H,), -0.01, jnp.float32)
    w4 = s * jax.random.normal(ks[3], (H, D_out), jnp.float32)
    b4 = jnp.zeros((D_out,), jnp.float32)
    return (w1, b1, w2, b2, w3, b3, w4, b4)


if __name__ == "__main__":
    D_in, H, D_out, N = 4, 32, 16, 8

    key = jax.random.PRNGKey(0)
    kp, kdata = jax.random.split(key)
    params = _init_params(kp, D_in, H, D_out)

    x_last, mask_last, ref_last = None, None, None
    # B=2: single-tile grid; B=37: multi-step parallel grid + batch padding.
    for B in (2, 37):
        kx, km = jax.random.split(jax.random.fold_in(kdata, B))
        x = jax.random.normal(kx, (B, N, D_in), jnp.float32)
        mask = (jax.random.uniform(km, (B, N)) > 0.3).astype(jnp.float32)

        out_m = jax.block_until_ready(deepsets_encoder(x, params, mask))
        ref_m = _reference(x, params, mask)
        assert out_m.shape == (B, D_out)
        assert jnp.allclose(out_m, ref_m, atol=3e-5, rtol=3e-5), "masked mismatch"

        out_p = jax.block_until_ready(deepsets_encoder(x, params, None))
        ref_p = _reference(x, params, None)
        assert jnp.allclose(out_p, ref_p, atol=3e-5, rtol=3e-5), "unmasked mismatch"

        x_last, mask_last, ref_last = x, mask, ref_m

    # bf16 compute path (full-rate MXU on v6e/v7x), f32 accumulate -> looser tol.
    out_bf16 = jax.block_until_ready(
        deepsets_encoder(x_last, params, mask_last, compute_dtype=jnp.bfloat16))
    assert out_bf16.shape == ref_last.shape
    assert jnp.allclose(out_bf16, ref_last, atol=5e-2, rtol=5e-2), "bf16 mismatch"

    print("KERNEL_OK")
</pallas_src>

<mosaic_0001>
module attributes {stable_mosaic.version = 11 : i64} {
  func.func @_deepsets_kernel(%arg0: i32, %arg1: memref<16x128xf32, #tpu.memory_space<vmem>>, %arg2: memref<1x16xf32, #tpu.memory_space<vmem>>, %arg3: memref<128x128xf32, #tpu.memory_space<vmem>>, %arg4: memref<1x128xf32, #tpu.memory_space<vmem>>, %arg5: memref<128x128xf32, #tpu.memory_space<vmem>>, %arg6: memref<1x128xf32, #tpu.memory_space<vmem>>, %arg7: memref<128x128xf32, #tpu.memory_space<vmem>>, %arg8: memref<1x128xf32, #tpu.memory_space<vmem>>, %arg9: memref<128x128xf32, #tpu.memory_space<vmem>>, %arg10: memref<1x128xf32, #tpu.memory_space<vmem>>, %arg11: memref<2x128xf32, #tpu.memory_space<vmem>>) attributes {dimension_semantics = [#tpu.dimension_semantics<parallel>], iteration_bounds = array<i64: 1>, scalar_prefetch = 0 : i64, scratch_operands = 0 : i64, tpu.core_type = #tpu.core_type<tc>, window_params = [{transform_indices = @transform_0, window_bounds = array<i64: 16, 128>}, {transform_indices = @transform_1, window_bounds = array<i64: 1, 16>}, {pipeline_mode = #tpu.pipeline_mode<synchronous>, transform_indices = @transform_2, window_bounds = array<i64: 128, 128>}, {pipeline_mode = #tpu.pipeline_mode<synchronous>, transform_indices = @transform_3, window_bounds = array<i64: 1, 128>}, {pipeline_mode = #tpu.pipeline_mode<synchronous>, transform_indices = @transform_4, window_bounds = array<i64: 128, 128>}, {pipeline_mode = #tpu.pipeline_mode<synchronous>, transform_indices = @transform_5, window_bounds = array<i64: 1, 128>}, {pipeline_mode = #tpu.pipeline_mode<synchronous>, transform_indices = @transform_6, window_bounds = array<i64: 128, 128>}, {pipeline_mode = #tpu.pipeline_mode<synchronous>, transform_indices = @transform_7, window_bounds = array<i64: 1, 128>}, {pipeline_mode = #tpu.pipeline_mode<synchronous>, transform_indices = @transform_8, window_bounds = array<i64: 128, 128>}, {pipeline_mode = #tpu.pipeline_mode<synchronous>, transform_indices = @transform_9, window_bounds = array<i64: 1, 128>}, {transform_indices = @transform_10, window_bounds = array<i64: 2, 128>}]} {
    %c0 = arith.constant 0 : index
    %c0_0 = arith.constant 0 : index
    %0 = vector.load %arg1[%c0, %c0_0] : memref<16x128xf32, #tpu.memory_space<vmem>>, vector<16x128xf32>
    %c0_1 = arith.constant 0 : index
    %c0_2 = arith.constant 0 : index
    %1 = vector.load %arg3[%c0_1, %c0_2] : memref<128x128xf32, #tpu.memory_space<vmem>>, vector<128x128xf32>
    %cst = arith.constant dense<0.000000e+00> : vector<16x128xf32>
    %2 = tpu.matmul %0, %1, %cst {dimension_numbers = #tpu.dot_dimension_numbers<[1], [0], [0], [1], [0, 0, 1, 1], [], []>} : vector<16x128xf32>, vector<128x128xf32>, vector<16x128xf32> -> vector<16x128xf32>
    %c0_3 = arith.constant 0 : index
    %c0_4 = arith.constant 0 : index
    %3 = vector.load %arg4[%c0_3, %c0_4] : memref<1x128xf32, #tpu.memory_space<vmem>>, vector<1x128xf32>
    %4 = vector.broadcast %3 : vector<1x128xf32> to vector<16x128xf32>
    %5 = arith.addf %2, %4 : vector<16x128xf32>
    %cst_5 = arith.constant 0.000000e+00 : f32
    %6 = vector.broadcast %cst_5 : f32 to vector<16x128xf32>
    %7 = arith.maximumf %5, %6 : vector<16x128xf32>
    %8 = tpu.iota {dimensions = array<i32: 0>} : vector<2x16xi32>
    %9 = tpu.iota {dimensions = array<i32: 1>} : vector<2x16xi32>
    %c8_i32 = arith.constant 8 : i32
    %10 = vector.broadcast %c8_i32 : i32 to vector<2x16xi32>
    %11 = arith.muli %8, %10 : vector<2x16xi32>
    %12 = arith.cmpi sge, %9, %11 : vector<2x16xi32>
    %c8_i32_6 = arith.constant 8 : i32
    %13 = vector.broadcast %c8_i32_6 : i32 to vector<2x16xi32>
    %14 = arith.addi %11, %13 : vector<2x16xi32>
    %15 = arith.cmpi slt, %9, %14 : vector<2x16xi32>
    %16 = arith.andi %12, %15 : vector<2x16xi1>
    %c0_7 = arith.constant 0 : index
    %c0_8 = arith.constant 0 : index
    %17 = vector.load %arg2[%c0_7, %c0_8] : memref<1x16xf32, #tpu.memory_space<vmem>>, vector<1x16xf32>
    %cst_9 = arith.constant 0.000000e+00 : f32
    %18 = vector.shape_cast %17 : vector<1x16xf32> to vector<1x16xf32>
    %19 = vector.broadcast %18 : vector<1x16xf32> to vector<2x16xf32>
    %20 = vector.broadcast %cst_9 : f32 to vector<2x16xf32>
    %21 = arith.select %16, %19, %20 : vector<2x16xi1>, vector<2x16xf32>
    %cst_10 = arith.constant dense<0.000000e+00> : vector<2xf32>
    %22 = vector.multi_reduction <add>, %21, %cst_10 [1] : vector<2x16xf32> to vector<2xf32>
    %23 = vector.shape_cast %22 : vector<2xf32> to vector<2x1xf32>
    %cst_11 = arith.constant dense<0.000000e+00> : vector<2x128xf32>
    %24 = tpu.matmul %21, %7, %cst_11 {dimension_numbers = #tpu.dot_dimension_numbers<[1], [0], [0], [1], [0, 0, 1, 1], [], []>} : vector<2x16xf32>, vector<16x128xf32>, vector<2x128xf32> -> vector<2x128xf32>
    %c0_12 = arith.constant 0 : index
    %c0_13 = arith.constant 0 : index
    %25 = vector.load %arg5[%c0_12, %c0_13] : memref<128x128xf32, #tpu.memory_space<vmem>>, vector<128x128xf32>
    %cst_14 = arith.constant dense<0.000000e+00> : vector<2x128xf32>
    %26 = tpu.matmul %24, %25, %cst_14 {dimension_numbers = #tpu.dot_dimension_numbers<[1], [0], [0], [1], [0, 0, 1, 1], [], []>} : vector<2x128xf32>, vector<128x128xf32>, vector<2x128xf32> -> vector<2x128xf32>
    %c0_15 = arith.constant 0 : index
    %c0_16 = arith.constant 0 : index
    %27 = vector.load %arg6[%c0_15, %c0_16] : memref<1x128xf32, #tpu.memory_space<vmem>>, vector<1x128xf32>
    %28 = vector.broadcast %23 : vector<2x1xf32> to vector<2x128xf32>
    %29 = vector.broadcast %27 : vector<1x128xf32> to vector<2x128xf32>
    %30 = arith.mulf %28, %29 : vector<2x128xf32>
    %31 = arith.addf %26, %30 : vector<2x128xf32>
    %c0_17 = arith.constant 0 : index
    %c0_18 = arith.constant 0 : index
    %32 = vector.load %arg7[%c0_17, %c0_18] : memref<128x128xf32, #tpu.memory_space<vmem>>, vector<128x128xf32>
    %cst_19 = arith.constant dense<0.000000e+00> : vector<2x128xf32>
    %33 = tpu.matmul %31, %32, %cst_19 {dimension_numbers = #tpu.dot_dimension_numbers<[1], [0], [0], [1], [0, 0, 1, 1], [], []>} : vector<2x128xf32>, vector<128x128xf32>, vector<2x128xf32> -> vector<2x128xf32>
    %c0_20 = arith.constant 0 : index
    %c0_21 = arith.constant 0 : index
    %34 = vector.load %arg8[%c0_20, %c0_21] : memref<1x128xf32, #tpu.memory_space<vmem>>, vector<1x128xf32>
    %35 = vector.broadcast %34 : vector<1x128xf32> to vector<2x128xf32>
    %36 = arith.addf %33, %35 : vector<2x128xf32>
    %cst_22 = arith.constant 0.000000e+00 : f32
    %37 = vector.broadcast %cst_22 : f32 to vector<2x128xf32>
    %38 = arith.maximumf %36, %37 : vector<2x128xf32>
    %c0_23 = arith.constant 0 : index
    %c0_24 = arith.constant 0 : index
    %39 = vector.load %arg9[%c0_23, %c0_24] : memref<128x128xf32, #tpu.memory_space<vmem>>, vector<128x128xf32>
    %cst_25 = arith.constant dense<0.000000e+00> : vector<2x128xf32>
    %40 = tpu.matmul %38, %39, %cst_25 {dimension_numbers = #tpu.dot_dimension_numbers<[1], [0], [0], [1], [0, 0, 1, 1], [], []>} : vector<2x128xf32>, vector<128x128xf32>, vector<2x128xf32> -> vector<2x128xf32>
    %c0_26 = arith.constant 0 : index
    %c0_27 = arith.constant 0 : index
    %41 = vector.load %arg10[%c0_26, %c0_27] : memref<1x128xf32, #tpu.memory_space<vmem>>, vector<1x128xf32>
    %42 = vector.broadcast %41 : vector<1x128xf32> to vector<2x128xf32>
    %43 = arith.addf %40, %42 : vector<2x128xf32>
    %c0_28 = arith.constant 0 : index
    %c0_29 = arith.constant 0 : index
    %44 = vector.load %arg11[%c0_28, %c0_29] : memref<2x128xf32, #tpu.memory_space<vmem>>, vector<2x128xf32>
    tpu.vector_store %arg11[%c0_28, %c0_29], %43 {strides = array<i32>} : memref<2x128xf32, #tpu.memory_space<vmem>>, vector<2x128xf32>,
    return
  }
  func.func @transform_0(%arg0: i32) -> (i32, i32) {
    %c0_i32 = arith.constant 0 : i32
    %c0_i32_0 = arith.constant 0 : i32
    return %arg0, %c0_i32 : i32, i32
  }
  func.func @transform_1(%arg0: i32) -> (i32, i32) {
    %c0_i32 = arith.constant 0 : i32
    %c0_i32_0 = arith.constant 0 : i32
    return %arg0, %c0_i32 : i32, i32
  }
  func.func @transform_2(%arg0: i32) -> (i32, i32) {
    %c0_i32 = arith.constant 0 : i32
    %c0_i32_0 = arith.constant 0 : i32
    %c0_i32_1 = arith.constant 0 : i32
    return %c0_i32, %c0_i32_0 : i32, i32
  }
  func.func @transform_3(%arg0: i32) -> (i32, i32) {
    %c0_i32 = arith.constant 0 : i32
    %c0_i32_0 = arith.constant 0 : i32
    %c0_i32_1 = arith.constant 0 : i32
    return %c0_i32, %c0_i32_0 : i32, i32
  }
  func.func @transform_4(%arg0: i32) -> (i32, i32) {
    %c0_i32 = arith.constant 0 : i32
    %c0_i32_0 = arith.constant 0 : i32
    %c0_i32_1 = arith.constant 0 : i32
    return %c0_i32, %c0_i32_0 : i32, i32
  }
  func.func @transform_5(%arg0: i32) -> (i32, i32) {
    %c0_i32 = arith.constant 0 : i32
    %c0_i32_0 = arith.constant 0 : i32
    %c0_i32_1 = arith.constant 0 : i32
    return %c0_i32, %c0_i32_0 : i32, i32
  }
  func.func @transform_6(%arg0: i32) -> (i32, i32) {
    %c0_i32 = arith.constant 0 : i32
    %c0_i32_0 = arith.constant 0 : i32
    %c0_i32_1 = arith.constant 0 : i32
    return %c0_i32, %c0_i32_0 : i32, i32
  }
  func.func @transform_7(%arg0: i32) -> (i32, i32) {
    %c0_i32 = arith.constant 0 : i32
    %c0_i32_0 = arith.constant 0 : i32
    %c0_i32_1 = arith.constant 0 : i32
    return %c0_i32, %c0_i32_0 : i32, i32
  }
  func.func @transform_8(%arg0: i32) -> (i32, i32) {
    %c0_i32 = arith.constant 0 : i32
    %c0_i32_0 = arith.constant 0 : i32
    %c0_i32_1 = arith.constant 0 : i32
    return %c0_i32, %c0_i32_0 : i32, i32
  }
  func.func @transform_9(%arg0: i32) -> (i32, i32) {
    %c0_i32 = arith.constant 0 : i32
    %c0_i32_0 = arith.constant 0 : i32
    %c0_i32_1 = arith.constant 0 : i32
    return %c0_i32, %c0_i32_0 : i32, i32
  }
  func.func @transform_10(%arg0: i32) -> (i32, i32) {
    %c0_i32 = arith.constant 0 : i32
    %c0_i32_0 = arith.constant 0 : i32
    return %arg0, %c0_i32 : i32, i32
  }
}

</mosaic_0001>

<bundles_post_ra>
// kernel: tpu_custom_call.1
= control target key start
LH: loop header
LB: loop body
LE: loop exit
PB: predicated region body
PF: predicated region fallthrough
CT: control target
= control target key end

     0   :  { %15 = vsyncpa [#allocation3], 0  ;;  %s1298_s0 = inlined_call_operand.hbm [shape: f32[16,128], index: 0, kind: input, shape index: {}]   ;;  %s1299_s1 = inlined_call_operand.vmem [shape: f32[1,16], index: 1, kind: input, shape index: {}]   ;;  %s1300_s2 = inlined_call_operand.hbm [shape: f32[128,128], index: 2, kind: input, shape index: {}]   ;;  %s1301_s3 = inlined_call_operand.vmem [shape: f32[1,128], index: 3, kind: input, shape index: {}]   ;;  %s1302_s4 = inlined_call_operand.hbm [shape: f32[128,128], index: 4, kind: input, shape index: {}]   ;;  %s1303_s5 = inlined_call_operand.vmem [shape: f32[1,128], index: 5, kind: input, shape index: {}]   ;;  %s1304_s6 = inlined_call_operand.hbm [shape: f32[128,128], index: 6, kind: input, shape index: {}]   ;;  %s1305_s7 = inlined_call_operand.vmem [shape: f32[1,128], index: 7, kind: input, shape index: {}]   ;;  %s1306_s8 = inlined_call_operand.hbm [shape: f32[128,128], index: 8, kind: input, shape index: {}]   ;;  %s1307_s9 = inlined_call_operand.vmem [shape: f32[1,128], index: 9, kind: input, shape index: {}]   ;;  %s1308_s10 = inlined_call_operand.hbm [shape: f32[2,128], index: 10, kind: output, shape index: {}]  }
   0x1   :  { %16 = vsyncpa [#allocation6], 0 }
   0x2   :  { %17 = vsyncpa [#allocation9], 0 }
   0x3   :  { %18 = vsyncpa [#allocation4], 0  ;;  %s1083_s13 = smov [#allocation5]   ;;  %s1084_s15 = smov [#allocation8]  }
   0x4   :  { %s38_s14 = sshll.u32 %s1083_s13, 4  ;;  %s66_s16 = sshll.u32 %s1084_s15, 4  ;;  %s39_s14 = int_to_ptr.vmem [resolvable:$true] %s38_s14  ;;  %s1149_s16 = int_to_ptr.vmem [resolvable:$true] %s66_s16 }
   0x5   :  { %s943_s19 = scalar_lea.hbm %s1300_s2, 2048 }
   0x6   :  { %p944_p0 = scmp.ne.s32.totalorder %s1300_s2, %s943_s19  ;;  %p947_p1 = scmp.lt.u32.totalorder %s943_s19, %s1300_s2 }
   0x8   :  { %p949_p2 = pnand %p947_p1, %p944_p0 }
   0xa   :  { %952 = shalt.err (!%p949_p2)
}
   0xb   :  { %s953_s24 = scalar_lea.vmem %s39_s14, 2048  ;;  %p958_p4 = scmp.lt.s32.totalorder %s39_s14, %s39_s14 }
   0xc   :  { %p954_p3 = scmp.ne.s32.totalorder %s39_s14, %s953_s24  ;;  %p959_p5 = scmp.lt.s32.totalorder %s953_s24, %s953_s24 }
   0xe   :  { %p960_p6 = por %p959_p5, %p958_p4 }
  0x10   :  { %p961_p7 = pnand %p960_p6, %p954_p3 }
  0x12   :  { %964 = shalt.err (!%p961_p7)
}
  0x13   :  { %s1085_s25 = smov 128   ;;  %s1086_s26 = smov 8  }
  0x14   :  { %44 = dma.hbm_to_vmem [thread:$0]  %s1300_s2, 2048, %s39_s14, [#allocation6], %s1085_s25, %s1085_s25, %s1086_s26  }
  0x15   :  { %s965_s11 = scalar_lea.hbm %s1304_s6, 2048 }
  0x16   :  { %p966_p8 = scmp.ne.s32.totalorder %s1304_s6, %s965_s11  ;;  %p969_p9 = scmp.lt.u32.totalorder %s965_s11, %s1304_s6 }
  0x18   :  { %p971_p10 = pnand %p969_p9, %p966_p8 }
  0x1a   :  { %974 = shalt.err (!%p971_p10)
}
  0x1b   :  { %s975_s18 = scalar_lea.vmem %s1149_s16, 2048  ;;  %p980_p12 = scmp.lt.s32.totalorder %s1149_s16, %s1149_s16 }
  0x1c   :  { %p976_p11 = scmp.ne.s32.totalorder %s1149_s16, %s975_s18  ;;  %p981_p13 = scmp.lt.s32.totalorder %s975_s18, %s975_s18 }
  0x1e   :  { %p982_p0 = por %p981_p13, %p980_p12 }
  0x20   :  { %p983_p1 = pnand %p982_p0, %p976_p11 }
  0x22   :  { %986 = shalt.err (!%p983_p1)
}
  0x23   :  { %72 = dma.hbm_to_vmem [thread:$0]  %s1304_s6, 2048, %s1149_s16, [#allocation9], %s1085_s25, %s1085_s25, %s1086_s26  }
  0x24   :  { %s1087_s19 = smov [#allocation2]   ;;  %s1088_s21 = smov [#allocation7]  }
  0x25   :  { %s24_s20 = sshll.u32 %s1087_s19, 4  ;;  %s52_s22 = sshll.u32 %s1088_s21, 4  ;;  %s25_s20 = int_to_ptr.vmem [resolvable:$true] %s24_s20  ;;  %s1186_s22 = int_to_ptr.vmem [resolvable:$true] %s52_s22 }
  0x26   :  { %s987_s27 = scalar_lea.hbm %s1298_s0, 256 }
  0x27   :  { %p988_p2 = scmp.ne.s32.totalorder %s1298_s0, %s987_s27  ;;  %p991_p3 = scmp.lt.u32.totalorder %s987_s27, %s1298_s0 }
  0x29   :  { %p993_p4 = pnand %p991_p3, %p988_p2 }
  0x2b   :  { %996 = shalt.err (!%p993_p4)
}
  0x2c   :  { %s997_s6 = scalar_lea.vmem %s25_s20, 256  ;;  %p1002_p6 = scmp.lt.s32.totalorder %s25_s20, %s25_s20 }
  0x2d   :  { %p998_p5 = scmp.ne.s32.totalorder %s25_s20, %s997_s6  ;;  %p1003_p7 = scmp.lt.s32.totalorder %s997_s6, %s997_s6 }
  0x2f   :  { %p1004_p8 = por %p1003_p7, %p1002_p6 }
  0x31   :  { %p1005_p9 = pnand %p1004_p8, %p998_p5 }
  0x33   :  { %1008 = shalt.err (!%p1005_p9)
}
  0x34   :  { %30 = dma.hbm_to_vmem [thread:$0]  %s1298_s0, 256, %s25_s20, [#allocation3], %s1085_s25, %s1085_s25, %s1086_s26  }
  0x35   :  { %s1009_s17 = scalar_lea.hbm %s1302_s4, 2048 }
  0x36   :  { %p1010_p10 = scmp.ne.s32.totalorder %s1302_s4, %s1009_s17  ;;  %p1013_p11 = scmp.lt.u32.totalorder %s1009_s17, %s1302_s4 }
  0x38   :  { %p1015_p12 = pnand %p1013_p11, %p1010_p10 }
  0x3a   :  { %1018 = shalt.err (!%p1015_p12)
}
  0x3b   :  { %s1019_s21 = scalar_lea.vmem %s1186_s22, 2048  ;;  %p1024_p0 = scmp.lt.s32.totalorder %s1186_s22, %s1186_s22 }
  0x3c   :  { %p1020_p13 = scmp.ne.s32.totalorder %s1186_s22, %s1019_s21  ;;  %p1025_p1 = scmp.lt.s32.totalorder %s1019_s21, %s1019_s21 }
  0x3e   :  { %p1026_p2 = por %p1025_p1, %p1024_p0 }
  0x40   :  { %p1027_p3 = pnand %p1026_p2, %p1020_p13 }
  0x42   :  { %1030 = shalt.err (!%p1027_p3)
}
  0x43   :  { %58 = dma.hbm_to_vmem [thread:$0]  %s1302_s4, 2048, %s1186_s22, [#allocation6], %s1085_s25, %s1085_s25, %s1086_s26  }
  0x44   :  { %s1089_s23 = smov [#allocation10]   ;;  %s1031_s29 = scalar_lea.hbm %s1306_s8, 2048 }
  0x45   :  { %s80_s24 = sshll.u32 %s1089_s23, 4  ;;  %p1032_p4 = scmp.ne.s32.totalorder %s1306_s8, %s1031_s29  ;;  %s81_s24 = int_to_ptr.vmem [resolvable:$true] %s80_s24 }
  0x46   :  { %p1035_p5 = scmp.lt.u32.totalorder %s1031_s29, %s1306_s8 }
  0x48   :  { %p1037_p6 = pnand %p1035_p5, %p1032_p4 }
  0x4a   :  { %1040 = shalt.err (!%p1037_p6)
}
  0x4b   :  { %s1041_s12 = scalar_lea.vmem %s81_s24, 2048  ;;  %p1046_p8 = scmp.lt.s32.totalorder %s81_s24, %s81_s24 }
  0x4c   :  { %p1042_p7 = scmp.ne.s32.totalorder %s81_s24, %s1041_s12  ;;  %p1047_p9 = scmp.lt.s32.totalorder %s1041_s12, %s1041_s12 }
  0x4e   :  { %p1048_p10 = por %p1047_p9, %p1046_p8 }
  0x50   :  { %p1049_p11 = pnand %p1048_p10, %p1042_p7 }
  0x52   :  { %1052 = shalt.err (!%p1049_p11)
}
  0x53   :  { %86 = dma.hbm_to_vmem [thread:$0]  %s1306_s8, 2048, %s81_s24, [#allocation9], %s1085_s25, %s1085_s25, %s1086_s26  }
  0x54   :  { %1075 = dma.done.wait [#allocation3], 256  }
  0x55   :  { %1076 = vsyncadd [#allocation3], 4294967040 }
  0x56   :  { %1077 = dma.done.wait [#allocation6], 4096  }
  0x57   :  { %1078 = vsyncadd [#allocation6], 4294963200 }
  0x58   :  { %1079 = dma.done.wait [#allocation9], 4096  }
  0x59   :  { %1080 = vsyncadd [#allocation9], 4294963200  ;;  %v106_v0 = vld [vmem:[#allocation5] sm:$0xff]  ;;  %v107_v1 = vld [vmem:[#allocation5 + $0x8] sm:$0xff]  ;;  %v1090_v26 = vmov 0.0|0.0   ;;  %vm1091_vm0 = vmmov 0   ;;  %v206_v28 = vlaneseq }
  0x5a   :  { %v108_v2 = vld [vmem:[#allocation5 + $0x10] sm:$0xff]  ;;  %v825_v3 = vpack.c.bf16 %v107_v1, %v106_v0  ;;  %v109_v4 = vld [vmem:[#allocation5 + $0x18] sm:$0xff]  ;;  %v110_v6 = vld [vmem:[#allocation5 + $0x20] sm:$0xff]  ;;  %857 = vmatprep.subr.bf16.mxu1 %v1090_v26  ;;  %v1092_v27 = vmov 0.0   ;;  %vm227_vm4 = vcmask 130048   ;;  %vm223_vm5 = vcmask 123904  }
  0x5b   :  { %v829_v5 = vpack.c.bf16 %v109_v4, %v108_v2  ;;  %v111_v7 = vld [vmem:[#allocation5 + $0x28] sm:$0xff]  ;;  %v104_v9 = vld [vmem:[#allocation2] sm:$0xff]  ;;  %v113_v11 = vld [vmem:[#allocation5 + $0x38] sm:$0xff]  ;;  %717 = vmatprep.mubr.msk.f32.mxu1 %vm1091_vm0, %v1092_v27  ;;  %v207_v29 = vshrl.u32 %v206_v28, 7  ;;  %v209_v32 = vand.u32 127, %v206_v28  ;;  %s1093_s2 = smov [#allocation11]  }
  0x5c   :  { %826 = vmatprep.subr.bf16.mxu0 %v825_v3  ;;  %v833_v8 = vpack.c.bf16 %v111_v7, %v110_v6  ;;  %v112_v10 = vld [vmem:[#allocation5 + $0x30] sm:$0xff]  ;;  %710 = vmatprep.mubr.f32.mxu0 %v104_v9  ;;  %v114_v13 = vld [vmem:[#allocation5 + $0x40] sm:$0xff]  ;;  %v115_v14 = vld [vmem:[#allocation5 + $0x48] sm:$0xff]  ;;  %s589_s14 = sshll.u32 %s1093_s2, 4  ;;  %s590_s14 = int_to_ptr.vmem [resolvable:$true] %s589_s14 }
  0x5d   :  { %828 = vmatpush3.bf16.msra.mxu0 %v825_v3  ;;  %v837_v12 = vpack.c.bf16 %v113_v11, %v112_v10  ;;  %v841_v15 = vpack.c.bf16 %v115_v14, %v114_v13  ;;  %v116_v16 = vld [vmem:[#allocation5 + $0x50] sm:$0xff]  ;;  %v117_v17 = vld [vmem:[#allocation5 + $0x58] sm:$0xff]  ;;  %v118_v19 = vld [vmem:[#allocation5 + $0x60] sm:$0xff]  ;;  %v210_v30 = vmul.u32 8, %v207_v29  ;;  %s1053_s19 = scalar_lea.vmem %s590_s14, 32  ;;  %p1058_p13 = scmp.lt.s32.totalorder %s590_s14, %s590_s14 }
  0x5e   :  { %830 = vmatprep.subr.bf16.mxu0 %v829_v5  ;;  %v845_v18 = vpack.c.bf16 %v117_v17, %v116_v16  ;;  %v119_v20 = vld [vmem:[#allocation5 + $0x68] sm:$0xff]  ;;  %v120_v22 = vld [vmem:[#allocation5 + $0x70] sm:$0xff]  ;;  %v121_v23 = vld [vmem:[#allocation5 + $0x78] sm:$0xff]  ;;  %p1054_p12 = scmp.ne.s32.totalorder %s590_s14, %s1053_s19  ;;  %p1059_p0 = scmp.lt.s32.totalorder %s1053_s19, %s1053_s19 }
  0x5f   :  { %v849_v21 = vpack.c.bf16 %v119_v20, %v118_v19  ;;  %v853_v24 = vpack.c.bf16 %v121_v23, %v120_v22  ;;  %v105_v25 = vld [vmem:[#allocation2 + $0x8] sm:$0xff]  ;;  %v600_v31 = vld [vmem:[%s1301_s3] ss:$0 sm:$0xff]  ;;  %v212_v33 = vadd.s32 8, %v210_v30  ;;  %vm211_vm1 = vcmp.ge.s32.totalorder %v209_v32, %v210_v30  ;;  %v301_v41 = vld [vmem:[#allocation7] sm:$0xff] }
  0x60   :  { %v601_v40 = vld [vmem:[%s1299_s1] ss:$0 sm:$0xff]  ;;  %v302_v42 = vld [vmem:[#allocation7 + $0x8] sm:$0xff]  ;;  %v304_v47 = vld [vmem:[#allocation7 + $0x18] sm:$0xff]  ;;  %p1060_p1 = por %p1059_p0, %p1058_p13 }
  0x61   :  { %832 = vmatpush3.bf16.msra.mxu0 %v829_v5  ;;  %vm213_vm2 = vcmp.lt.s32.totalorder %v209_v32, %v212_v33  ;;  %v861_v45 = vpack.c.bf16 %v302_v42, %v301_v41  ;;  %v303_v46 = vld [vmem:[#allocation7 + $0x10] sm:$0xff]  ;;  %v305_v49 = vld [vmem:[#allocation7 + $0x20] sm:$0xff]  ;;  %v306_v50 = vld [vmem:[#allocation7 + $0x28] sm:$0xff] }
  0x62   :  { %834 = vmatprep.subr.bf16.mxu0 %v833_v8  ;;  %vm214_vm3 = vmand %vm211_vm1, %vm213_vm2  ;;  %v864_v48 = vpack.c.bf16 %v304_v47, %v303_v46  ;;  %v867_v51 = vpack.c.bf16 %v306_v50, %v305_v49  ;;  %v307_v52 = vld [vmem:[#allocation7 + $0x30] sm:$0xff]  ;;  %v308_v53 = vld [vmem:[#allocation7 + $0x38] sm:$0xff]  ;;  %p1061_p2 = pnand %p1060_p1, %p1054_p12 }
  0x63   :  { %v222_v44 = vsel %vm214_vm3, %v601_v40, 0.0  ;;  %v870_v54 = vpack.c.bf16 %v308_v53, %v307_v52  ;;  %v309_v55 = vld [vmem:[#allocation7 + $0x40] sm:$0xff]  ;;  %v310_v56 = vld [vmem:[#allocation7 + $0x48] sm:$0xff]  ;;  %v311_v58 = vld [vmem:[#allocation7 + $0x50] sm:$0xff] }
  0x64   :  { %v873_v57 = vpack.c.bf16 %v310_v56, %v309_v55  ;;  %v312_v59 = vld [vmem:[#allocation7 + $0x58] sm:$0xff]  ;;  %v313_v61 = vld [vmem:[#allocation7 + $0x60] sm:$0xff]  ;;  %v314_v62 = vld [vmem:[#allocation7 + $0x68] sm:$0xff]  ;;  %v224_v6 = vsel %vm223_vm5, %v222_v44, 0.0 }
  0x65   :  { %836 = vmatpush3.bf16.msra.mxu0 %v833_v8  ;;  %v876_v60 = vpack.c.bf16 %v312_v59, %v311_v58  ;;  %v879_v63 = vpack.c.bf16 %v314_v62, %v313_v61  ;;  %v315_v0 = vld [vmem:[#allocation7 + $0x70] sm:$0xff]  ;;  %v316_v1 = vld [vmem:[#allocation7 + $0x78] sm:$0xff]  ;;  %v395_v3 = vld [vmem:[#allocation8] sm:$0xff]  ;;  %225 = vadd.xlane.f32.xlu0 %v224_v6 }
  0x66   :  { %838 = vmatprep.subr.bf16.mxu0 %v837_v12  ;;  %v882_v2 = vpack.c.bf16 %v316_v1, %v315_v0  ;;  %v396_v4 = vld [vmem:[#allocation8 + $0x8] sm:$0xff]  ;;  %v397_v5 = vld [vmem:[#allocation8 + $0x10] sm:$0xff]  ;;  %v398_v8 = vld [vmem:[#allocation8 + $0x18] sm:$0xff] }
  0x67   :  { %v885_v7 = vpack.c.bf16 %v396_v4, %v395_v3  ;;  %v888_v9 = vpack.c.bf16 %v398_v8, %v397_v5  ;;  %v399_v10 = vld [vmem:[#allocation8 + $0x20] sm:$0xff]  ;;  %v400_v11 = vld [vmem:[#allocation8 + $0x28] sm:$0xff]  ;;  %v401_v13 = vld [vmem:[#allocation8 + $0x30] sm:$0xff] }
  0x68   :  { %v402_v14 = vld [vmem:[#allocation8 + $0x38] sm:$0xff]  ;;  %v403_v16 = vld [vmem:[#allocation8 + $0x40] sm:$0xff]  ;;  %v404_v17 = vld [vmem:[#allocation8 + $0x48] sm:$0xff] }
  0x69   :  { %840 = vmatpush3.bf16.msra.mxu0 %v837_v12  ;;  %v891_v12 = vpack.c.bf16 %v400_v11, %v399_v10  ;;  %v405_v19 = vld [vmem:[#allocation8 + $0x50] sm:$0xff]  ;;  %v406_v20 = vld [vmem:[#allocation8 + $0x58] sm:$0xff]  ;;  %v407_v22 = vld [vmem:[#allocation8 + $0x60] sm:$0xff] }
  0x6a   :  { %842 = vmatprep.subr.bf16.mxu0 %v841_v15  ;;  %v408_v23 = vld [vmem:[#allocation8 + $0x68] sm:$0xff]  ;;  %v409_v29 = vld [vmem:[#allocation8 + $0x70] sm:$0xff]  ;;  %v410_v30 = vld [vmem:[#allocation8 + $0x78] sm:$0xff] }
  0x6b   :  { %v489_v32 = vld [vmem:[#allocation10] sm:$0xff]  ;;  %v490_v33 = vld [vmem:[#allocation10 + $0x8] sm:$0xff]  ;;  %v496_v41 = vld [vmem:[#allocation10 + $0x38] sm:$0xff] }
  0x6c   :  { %v499_v46 = vld [vmem:[#allocation10 + $0x50] sm:$0xff]  ;;  %v500_v47 = vld [vmem:[#allocation10 + $0x58] sm:$0xff]  ;;  %v501_v49 = vld [vmem:[#allocation10 + $0x60] sm:$0xff] }
  0x6d   :  { %844 = vmatpush3.bf16.msra.mxu0 %v841_v15  ;;  %v894_v15 = vpack.c.bf16 %v402_v14, %v401_v13  ;;  %v502_v50 = vld [vmem:[#allocation10 + $0x68] sm:$0xff]  ;;  %v603_v53 = vld [vmem:[%s1303_s5] ss:$0 sm:$0xff]  ;;  %v504_v59 = vld [vmem:[#allocation10 + $0x78] sm:$0xff] }
  0x6e   :  { %846 = vmatprep.subr.bf16.mxu0 %v845_v18  ;;  %v503_v58 = vld [vmem:[#allocation10 + $0x70] sm:$0xff] }
  0x6f   :  { %v604_v61 = vld [vmem:[%s1305_s7] ss:$0 sm:$0xff] }
  0x70   :  { %v605_v1 = vld [vmem:[%s1307_s9] ss:$0 sm:$0xff] }
  0x71   :  { %848 = vmatpush3.bf16.msra.mxu0 %v845_v18  ;;  %v897_v18 = vpack.c.bf16 %v404_v17, %v403_v16 }
  0x72   :  { %850 = vmatprep.subr.bf16.mxu0 %v849_v21 }
  0x75   :  { %852 = vmatpush3.bf16.msra.mxu0 %v849_v21  ;;  %v900_v21 = vpack.c.bf16 %v406_v20, %v405_v19 }
  0x76   :  { %854 = vmatprep.subr.bf16.mxu0 %v853_v24 }
  0x79   :  { %856 = vmatpush3.bf16.msra.mxu0 %v853_v24  ;;  %v903_v24 = vpack.c.bf16 %v408_v23, %v407_v22 }
  0x7a   :  { %884 = vmatprep.subr.bf16.mxu0 %v1090_v26 }
  0x7c   :  { %711 = vmatmul.mubr.f32.vlgmr.msra.gmra.mrb[0].mxu0 %v105_v25 }
  0x7d   :  { %787 = vmatprep.mubr.msk.f32.mxu0 %vm1091_vm0, %v1092_v27  ;;  %886 = vmatpush3.bf16.msra.mxu0 %v885_v7 }
  0x7e   :  { %887 = vmatprep.subr.bf16.mxu0 %v1090_v26 }
  0x81   :  { %889 = vmatpush3.bf16.msra.mxu0 %v888_v9 }
  0x82   :  { %890 = vmatprep.subr.bf16.mxu0 %v1090_v26 }
  0x85   :  { %892 = vmatpush3.bf16.msra.mxu0 %v891_v12 }
  0x86   :  { %893 = vmatprep.subr.bf16.mxu0 %v1090_v26 }
  0x89   :  { %895 = vmatpush3.bf16.msra.mxu0 %v894_v15 }
  0x8a   :  { %896 = vmatprep.subr.bf16.mxu0 %v1090_v26 }
  0x8d   :  { %898 = vmatpush3.bf16.msra.mxu0 %v897_v18 }
  0x8e   :  { %899 = vmatprep.subr.bf16.mxu0 %v1090_v26 }
  0x91   :  { %901 = vmatpush3.bf16.msra.mxu0 %v900_v21 }
  0x92   :  { %902 = vmatprep.subr.bf16.mxu0 %v1090_v26 }
  0x95   :  { %904 = vmatpush3.bf16.msra.mxu0 %v903_v24 }
  0x96   :  { %905 = vmatprep.subr.bf16.mxu0 %v1090_v26 }
  0xf2   :  { %v226_v52 = vpop.xlane.xlu0 %225 }
 0x14f   :  { %v712_v34 = vpop.f32.mrb[0].mxu0 }
 0x150   :  { %v201_v35 = vadd.f32 %v712_v34, %v600_v31  ;;  %v195_v36 = vpop.f32.mrb[1].mxu0  ;;  %v491_v34 = vld [vmem:[#allocation10 + $0x10] sm:$0xff] }
 0x151   :  { %v196_v37 = vadd.f32 %v600_v31, %v195_v36  ;;  %v906_v31 = vpack.c.bf16 %v410_v30, %v409_v29  ;;  %v492_v36 = vld [vmem:[#allocation10 + $0x18] sm:$0xff] }
 0x152   :  { %v205_v38 = vmax.f32 %v201_v35, 0.0  ;;  %v909_v35 = vpack.c.bf16 %v490_v33, %v489_v32 }
 0x153   :  { %v204_v39 = vmax.f32 %v196_v37, 0.0  ;;  %907 = vmatpush3.bf16.msra.mxu0 %v906_v31  ;;  %v912_v37 = vpack.c.bf16 %v492_v36, %v491_v34 }
 0x155   :  { %v858_v43 = vpack.c.bf16 %v205_v38, %v204_v39  ;;  %v493_v38 = vld [vmem:[#allocation10 + $0x20] sm:$0xff]  ;;  %v494_v39 = vld [vmem:[#allocation10 + $0x28] sm:$0xff] }
 0x156   :  { %v915_v40 = vpack.c.bf16 %v494_v39, %v493_v38 }
 0x157   :  { %859 = vmatpush3.bf16.msra.mxu1 %v858_v43  ;;  %v497_v43 = vld [vmem:[#allocation10 + $0x40] sm:$0xff] }
 0x158   :  { %860 = vmatprep.subr.bf16.mxu1 %v1090_v26 }
 0x15a   :  { %718 = vmatmul.mubr.msk.f32.vlgmr.msra.gmra.mrb[0].mxu1 %vm227_vm4, %v222_v44  ;;  %v498_v44 = vld [vmem:[#allocation10 + $0x48] sm:$0xff] }
 0x15b   :  { %862 = vmatpush3.bf16.msra.mxu1 %v861_v45  ;;  %752 = vmatprep.mubr.msk.f32.mxu1 %vm1091_vm0, %v1092_v27  ;;  %v921_v45 = vpack.c.bf16 %v498_v44, %v497_v43 }
 0x15c   :  { %863 = vmatprep.subr.bf16.mxu1 %v1090_v26 }
 0x15f   :  { %865 = vmatpush3.bf16.msra.mxu1 %v864_v48  ;;  %v924_v48 = vpack.c.bf16 %v500_v47, %v499_v46 }
 0x160   :  { %866 = vmatprep.subr.bf16.mxu1 %v1090_v26 }
 0x163   :  { %868 = vmatpush3.bf16.msra.mxu1 %v867_v51  ;;  %v927_v51 = vpack.c.bf16 %v502_v50, %v501_v49 }
 0x164   :  { %869 = vmatprep.subr.bf16.mxu1 %v1090_v26 }
 0x167   :  { %871 = vmatpush3.bf16.msra.mxu1 %v870_v54  ;;  %v324_v54 = vmul.f32 %v603_v53, %v226_v52 }
 0x168   :  { %872 = vmatprep.subr.bf16.mxu1 %v1090_v26 }
 0x16b   :  { %874 = vmatpush3.bf16.msra.mxu1 %v873_v57 }
 0x16c   :  { %875 = vmatprep.subr.bf16.mxu1 %v1090_v26 }
 0x16f   :  { %877 = vmatpush3.bf16.msra.mxu1 %v876_v60  ;;  %v930_v60 = vpack.c.bf16 %v504_v59, %v503_v58 }
 0x170   :  { %878 = vmatprep.subr.bf16.mxu1 %v1090_v26 }
 0x173   :  { %880 = vmatpush3.bf16.msra.mxu1 %v879_v63 }
 0x174   :  { %881 = vmatprep.subr.bf16.mxu1 %v1090_v26 }
 0x177   :  { %883 = vmatpush3.bf16.msra.mxu1 %v882_v2 }
 0x178   :  { %908 = vmatprep.subr.bf16.mxu1 %v1090_v26 }
 0x22d   :  { %v297_v25 = vpop.f32.mrb[0].mxu1 }
 0x22e   :  { %v719_v28 = vpop.f32.mrb[1].mxu1  ;;  %753 = vmatmul.mubr.f32.vlgmr.msra.gmra.mrb[2].mxu1 %v297_v25 }
 0x22f   :  { %822 = vmatprep.mubr.msk.f32.mxu1 %vm1091_vm0, %v1092_v27  ;;  %910 = vmatpush3.bf16.msra.mxu1 %v909_v35  ;;  %v495_v27 = vld [vmem:[#allocation10 + $0x30] sm:$0xff] }
 0x230   :  { %911 = vmatprep.subr.bf16.mxu1 %v1090_v26  ;;  %v918_v42 = vpack.c.bf16 %v496_v41, %v495_v27 }
 0x233   :  { %913 = vmatpush3.bf16.msra.mxu1 %v912_v37 }
 0x234   :  { %914 = vmatprep.subr.bf16.mxu1 %v1090_v26 }
 0x237   :  { %916 = vmatpush3.bf16.msra.mxu1 %v915_v40 }
 0x238   :  { %917 = vmatprep.subr.bf16.mxu1 %v1090_v26 }
 0x23b   :  { %919 = vmatpush3.bf16.msra.mxu1 %v918_v42 }
 0x23c   :  { %920 = vmatprep.subr.bf16.mxu1 %v1090_v26 }
 0x23f   :  { %922 = vmatpush3.bf16.msra.mxu1 %v921_v45 }
 0x240   :  { %923 = vmatprep.subr.bf16.mxu1 %v1090_v26 }
 0x243   :  { %925 = vmatpush3.bf16.msra.mxu1 %v924_v48 }
 0x244   :  { %926 = vmatprep.subr.bf16.mxu1 %v1090_v26 }
 0x247   :  { %928 = vmatpush3.bf16.msra.mxu1 %v927_v51 }
 0x248   :  { %929 = vmatprep.subr.bf16.mxu1 %v1090_v26 }
 0x24b   :  { %931 = vmatpush3.bf16.msra.mxu1 %v930_v60 }
 0x301   :  { %v391_v55 = vpop.f32.mrb[2].mxu1 }
 0x302   :  { %v392_v56 = vadd.f32 %v391_v55, %v324_v54  ;;  %v754_v57 = vpop.f32.mrb[3].mxu1 }
 0x304   :  { %788 = vmatmul.mubr.f32.vlgmr.msra.gmra.mrb[2].mxu0 %v392_v56 }
 0x3d7   :  { %v484_v62 = vpop.f32.mrb[2].mxu0 }
 0x3d8   :  { %v485_v26 = vadd.f32 %v604_v61, %v484_v62  ;;  %v789_v63 = vpop.f32.mrb[3].mxu0 }
 0x3da   :  { %v488_v0 = vmax.f32 %v485_v26, 0.0 }
 0x3dc   :  { %823 = vmatmul.mubr.f32.vlgmr.msra.gmra.mrb[4].mxu1 %v488_v0 }
 0x4af   :  { %v578_v2 = vpop.f32.mrb[4].mxu1 }
 0x4b0   :  { %v579_v3 = vadd.f32 %v605_v1, %v578_v2  ;;  %v824_v4 = vpop.f32.mrb[5].mxu1 }
 0x4b2   :  { %582 = vst [vmem:[#allocation11] sm:$0x3] %v579_v3 }
 0x4b3   :  { %1064 = shalt.err (!%p1061_p2)
}
 0x4b4   :  { %s1065_s0 = scalar_lea.hbm %s1308_s10, 32 }
 0x4b5   :  { %p1066_p3 = scmp.ne.s32.totalorder %s1308_s10, %s1065_s0  ;;  %p1069_p4 = scmp.lt.u32.totalorder %s1065_s0, %s1308_s10 }
 0x4b7   :  { %p1071_p5 = pnand %p1069_p4, %p1066_p3 }
 0x4b9   :  { %1074 = shalt.err (!%p1071_p5)
}
 0x4ba   :  { %592 = dma.vmem_to_hbm [thread:$0]  %s590_s14, 32, %s1308_s10, [#allocation4]  }
 0x4bb   :  { %1081 = dma.done.wait [#allocation4], 32  }
 0x4bc   :  { %1082 = vsyncadd [#allocation4], 4294967264 }
 0x4bd   :  { %596 = vsyncpa [#allocation3], 1 }
 0x4be   :  { %597 = vsyncpa [#allocation6], 1 }
 0x4bf   :  { %598 = vsyncpa [#allocation9], 1 }
 0x4c0   :  { %599 = vsyncpa [#allocation4], 1 }

</bundles_post_ra>
